<compile_context>
chip_gen: v7x
topology: tpu7x:2x2x1
jax: 0.10.0
libtpu: 0.0.40
codegen_flags: <defaults>
</compile_context>

<pallas_src>
import functools

import numpy as np
import jax
import jax.numpy as jnp
from jax import lax
from jax.experimental import pallas as pl
from jax.experimental.pallas import tpu as pltpu


# FCN backbone hyper-parameters (kernel size, PyTorch padding='same' left pad).
# padding='same' pads (left, right) = ((K-1)//2, K//2): (3,4) / (2,2) / (1,1).
K1, PAD1 = 8, 3
K2, PAD2 = 5, 2
K3, PAD3 = 3, 1
C1, C2, C3 = 128, 256, 128

_BN_ROWS, _BN_LANES = 8, 256   # packed affine-parameter table shape


# --------------------------------------------------------------------------
# Fused whole-network kernel
# --------------------------------------------------------------------------
def _fcn_kernel(xc_ref, w1_ref, w2_ref, w3_ref, wfc_ref, bn_ref, out_ref,
                *, B, L, num_classes):
    """Whole FCN forward.  Activations live as (B*L, C) f32 values in VMEM."""
    BL = B * L

    # Packed per-channel affine params: one 8x256 f32 load, sliced in registers.
    bn = bn_ref[...]
    s1, b1 = bn[0:1, :C1], bn[1:2, :C1]
    s2, b2 = bn[2:3, :C2], bn[3:4, :C2]
    s3, b3 = bn[4:5, :C3], bn[5:6, :C3]
    bfc = bn[6:7, :num_classes]

    def bn_relu(y, s, b):
        # Folded eval-mode BatchNorm (per-channel affine) + ReLU, in f32.
        return jnp.maximum(y * s + b, 0.0)

    # ---- layer 1: im2col prepared in the wrapper (bf16) -> one MXU matmul ----
    h = bn_relu(jnp.dot(xc_ref[...], w1_ref[...],
                        preferred_element_type=jnp.float32), s1, b1)   # (BL, C1)

    # ---- layers 2 & 3: shift-and-accumulate 'same' convolution ----
    # y = sum_k  mask_k(roll(h, -d_k)) @ W[k],  d_k = k - pad_left.
    def conv(h, w_ref, K, pad_left):
        cin = h.shape[-1]
        cout = w_ref.shape[-1]
        # Row position within its sample (0..L-1), built without integer div/mod.
        pos = lax.broadcasted_iota(jnp.int32, (B, L, cin), 1).reshape(BL, cin)
        acc = jnp.zeros((BL, cout), jnp.float32)
        for k in range(K):            # static unrolled loop, K <= 8
            d = k - pad_left          # this tap reads h[t + d]
            hk = h if d == 0 else pltpu.roll(h, shift=(-d) % BL, axis=0)
            if d > 0:                 # tap reads past the end of the sample
                hk = jnp.where(pos < (L - d), hk, 0.0)
            elif d < 0:               # tap reads before the start of the sample
                hk = jnp.where(pos >= (-d), hk, 0.0)
            acc = acc + jnp.dot(hk.astype(jnp.bfloat16),
                                w_ref[k * cin:(k + 1) * cin, :],
                                preferred_element_type=jnp.float32)
        return acc

    h = bn_relu(conv(h, w2_ref, K2, PAD2), s2, b2)                    # (BL, C2)
    h = bn_relu(conv(h, w3_ref, K3, PAD3), s3, b3)                    # (BL, C3)

    # ---- global average pool as an MXU matmul + bf16 linear head ----
    r_ids = lax.broadcasted_iota(jnp.int32, (B, BL), 1)
    lo = lax.broadcasted_iota(jnp.int32, (B, BL), 0) * L
    pool = jnp.where((r_ids >= lo) & (r_ids < lo + L), 1.0 / L, 0.0)  # (B, BL)
    pooled = jnp.dot(pool.astype(jnp.bfloat16), h.astype(jnp.bfloat16),
                     preferred_element_type=jnp.float32)              # (B, C3)
    out_ref[...] = jnp.dot(pooled.astype(jnp.bfloat16), wfc_ref[...],
                           preferred_element_type=jnp.float32) + bfc


# --------------------------------------------------------------------------
# Wrapper: one pallas_call for the whole forward pass
# --------------------------------------------------------------------------
@jax.jit
def prototype_fcn_forward(x, packed):
    """x: (B, num_prototypes, n_var) float32.

    We use the TPU-friendly channels-last layout (B, L, C) with
    L = num_prototypes and C = n_var (PyTorch's NCW transpose is only a layout
    choice; the computed network is identical).
    """
    B, L, n_var = x.shape
    num_classes = packed["wfc"].shape[1]

    # Layer-1 im2col on the (tiny) raw input, pre-cast to bf16 for the MXU:
    # pad 'same' (left=3, right=4 for K=8) and concat the K shifted views.
    pad_r1 = K1 - 1 - PAD1
    x_pad = jnp.pad(x.astype(jnp.float32), ((0, 0), (PAD1, pad_r1), (0, 0)))
    x_cols = jnp.concatenate([x_pad[:, k:k + L, :] for k in range(K1)], axis=-1)
    x_cols = x_cols.reshape(B * L, K1 * n_var).astype(jnp.bfloat16)

    kernel = functools.partial(_fcn_kernel, B=B, L=L, num_classes=num_classes)
    return pl.pallas_call(
        kernel,
        out_shape=jax.ShapeDtypeStruct((B, num_classes), jnp.float32),
    )(x_cols, packed["w1"], packed["w2"], packed["w3"],
      packed["wfc"], packed["bn"])


# --------------------------------------------------------------------------
# Deterministic parameter initialization (synthetic; eval-mode BN folded)
# --------------------------------------------------------------------------
class _KeyGen:
    def __init__(self, key):
        self._key = key

    def __call__(self):
        self._key, sub = jax.random.split(self._key)
        return sub


def init_params(key, n_var, num_classes):
    """f32 'master' parameters (used by the XLA reference)."""
    kg = _KeyGen(key)

    def conv_w(cin, cout, k):
        # Generated as (K, Cin, Cout) (= PyTorch (Cout, Cin, K) transposed),
        # stored flattened in im2col / per-tap layout (K*Cin, Cout).
        fan_in = cin * k
        w = jax.random.normal(kg(), (k, cin, cout), jnp.float32) / np.sqrt(fan_in)
        return w.reshape(k * cin, cout)

    def bn_fold(c):
        # eval-mode BatchNorm1d folded into per-channel scale / bias
        gamma = 1.0 + 0.1 * jax.random.normal(kg(), (c,), jnp.float32)
        beta = 0.1 * jax.random.normal(kg(), (c,), jnp.float32)
        mean = 0.1 * jax.random.normal(kg(), (c,), jnp.float32)
        var = jnp.ones((c,), jnp.float32)
        scale = gamma / jnp.sqrt(var + 1e-5)
        bias = beta - mean * scale
        return scale, bias

    P = {}
    P["w1"] = conv_w(n_var, C1, K1); P["s1"], P["b1"] = bn_fold(C1)
    P["w2"] = conv_w(C1, C2, K2);    P["s2"], P["b2"] = bn_fold(C2)
    P["w3"] = conv_w(C2, C3, K3);    P["s3"], P["b3"] = bn_fold(C3)
    P["wfc"] = jax.random.normal(kg(), (C3, num_classes), jnp.float32) / np.sqrt(C3)
    P["bfc"] = 0.01 * jax.random.normal(kg(), (num_classes,), jnp.float32)
    return P


def pack_params(P, num_classes):
    """One-time (outside jit): bf16 weight casts + packed BN/bias table."""
    assert num_classes <= _BN_LANES
    bn = jnp.zeros((_BN_ROWS, _BN_LANES), jnp.float32)
    bn = bn.at[0, :C1].set(P["s1"]).at[1, :C1].set(P["b1"])
    bn = bn.at[2, :C2].set(P["s2"]).at[3, :C2].set(P["b2"])
    bn = bn.at[4, :C3].set(P["s3"]).at[5, :C3].set(P["b3"])
    bn = bn.at[6, :num_classes].set(P["bfc"])
    return {
        "w1": P["w1"].astype(jnp.bfloat16),
        "w2": P["w2"].astype(jnp.bfloat16),
        "w3": P["w3"].astype(jnp.bfloat16),
        "wfc": P["wfc"].astype(jnp.bfloat16),
        "bn": bn,
    }


# --------------------------------------------------------------------------
# Pure-JAX (XLA) reference, f32, for an in-script correctness check
# --------------------------------------------------------------------------
def _reference_forward(x, P):
    def conv_bn_relu(h, w_flat, s, b, K, pad_left):
        cin = w_flat.shape[0] // K
        w = w_flat.reshape(K, cin, w_flat.shape[1])                 # WIO layout
        y = lax.conv_general_dilated(
            h, w, window_strides=(1,),
            padding=[(pad_left, K - 1 - pad_left)],
            dimension_numbers=("NWC", "WIO", "NWC"))
        return jnp.maximum(y * s + b, 0.0)

    h = conv_bn_relu(x, P["w1"], P["s1"], P["b1"], K1, PAD1)
    h = conv_bn_relu(h, P["w2"], P["s2"], P["b2"], K2, PAD2)
    h = conv_bn_relu(h, P["w3"], P["s3"], P["b3"], K3, PAD3)
    pooled = jnp.mean(h, axis=1)                                    # (B, C3)
    return pooled @ P["wfc"] + P["bfc"]


if __name__ == "__main__":
    B, num_prototypes, n_var, num_classes = 2, 16, 4, 3

    key = jax.random.PRNGKey(0)
    k_x, k_p = jax.random.split(key)
    x = jax.random.normal(k_x, (B, num_prototypes, n_var), jnp.float32)
    P = init_params(k_p, n_var, num_classes)
    packed = pack_params(P, num_classes)

    logits = prototype_fcn_forward(x, packed)
    logits = jax.block_until_ready(logits)

    assert logits.shape == (B, num_classes)
    assert bool(jnp.all(jnp.isfinite(logits)))

    # Correctness vs. a pure-XLA f32 reference (kernel matmuls are bf16-in /
    # f32-accumulate, hence the loose tolerance).
    ref = _reference_forward(x, P)
    np.testing.assert_allclose(np.asarray(logits), np.asarray(ref),
                               rtol=5e-2, atol=5e-2)

    print("KERNEL_OK")
</pallas_src>

<mosaic_0001>
module attributes {stable_mosaic.version = 11 : i64} {
  func.func @_fcn_kernel(%arg0: memref<32x32xbf16, #tpu.memory_space<vmem>>, %arg1: memref<32x128xbf16, #tpu.memory_space<vmem>>, %arg2: memref<640x256xbf16, #tpu.memory_space<vmem>>, %arg3: memref<768x128xbf16, #tpu.memory_space<vmem>>, %arg4: memref<128x3xbf16, #tpu.memory_space<vmem>>, %arg5: memref<8x256xf32, #tpu.memory_space<vmem>>, %arg6: memref<2x3xf32, #tpu.memory_space<vmem>>) attributes {dimension_semantics = [], scalar_prefetch = 0 : i64, scratch_operands = 0 : i64, tpu.core_type = #tpu.core_type<tc>} {
    %c0 = arith.constant 0 : index
    %c0_0 = arith.constant 0 : index
    %0 = vector.load %arg5[%c0, %c0_0] : memref<8x256xf32, #tpu.memory_space<vmem>>, vector<8x256xf32>
    %1 = vector.extract_strided_slice %0 {offsets = [0, 0], sizes = [1, 128], strides = [1, 1]} : vector<8x256xf32> to vector<1x128xf32>
    %2 = vector.extract_strided_slice %0 {offsets = [1, 0], sizes = [1, 128], strides = [1, 1]} : vector<8x256xf32> to vector<1x128xf32>
    %3 = vector.extract_strided_slice %0 {offsets = [2, 0], sizes = [1, 256], strides = [1, 1]} : vector<8x256xf32> to vector<1x256xf32>
    %4 = vector.extract_strided_slice %0 {offsets = [3, 0], sizes = [1, 256], strides = [1, 1]} : vector<8x256xf32> to vector<1x256xf32>
    %5 = vector.extract_strided_slice %0 {offsets = [4, 0], sizes = [1, 128], strides = [1, 1]} : vector<8x256xf32> to vector<1x128xf32>
    %6 = vector.extract_strided_slice %0 {offsets = [5, 0], sizes = [1, 128], strides = [1, 1]} : vector<8x256xf32> to vector<1x128xf32>
    %7 = vector.extract_strided_slice %0 {offsets = [6, 0], sizes = [1, 3], strides = [1, 1]} : vector<8x256xf32> to vector<1x3xf32>
    %c0_1 = arith.constant 0 : index
    %c0_2 = arith.constant 0 : index
    %8 = vector.load %arg0[%c0_1, %c0_2] : memref<32x32xbf16, #tpu.memory_space<vmem>>, vector<32x32xbf16>
    %c0_3 = arith.constant 0 : index
    %c0_4 = arith.constant 0 : index
    %9 = vector.load %arg1[%c0_3, %c0_4] : memref<32x128xbf16, #tpu.memory_space<vmem>>, vector<32x128xbf16>
    %cst = arith.constant dense<0.000000e+00> : vector<32x128xf32>
    %10 = tpu.matmul %8, %9, %cst {dimension_numbers = #tpu.dot_dimension_numbers<[1], [0], [0], [1], [0, 0, 1, 1], [], []>} : vector<32x32xbf16>, vector<32x128xbf16>, vector<32x128xf32> -> vector<32x128xf32>
    %11 = vector.broadcast %1 : vector<1x128xf32> to vector<32x128xf32>
    %12 = arith.mulf %10, %11 : vector<32x128xf32>
    %13 = vector.broadcast %2 : vector<1x128xf32> to vector<32x128xf32>
    %14 = arith.addf %12, %13 : vector<32x128xf32>
    %cst_5 = arith.constant 0.000000e+00 : f32
    %15 = vector.broadcast %cst_5 : f32 to vector<32x128xf32>
    %16 = arith.maximumf %14, %15 : vector<32x128xf32>
    %17 = tpu.iota {dimensions = array<i32: 1>} : vector<2x16x128xi32>
    %18 = vector.shape_cast %17 : vector<2x16x128xi32> to vector<32x128xi32>
    %cst_6 = arith.constant 0.000000e+00 : f32
    %19 = vector.broadcast %cst_6 : f32 to vector<32x256xf32>
    %c2_i32 = arith.constant 2 : i32
    %20 = tpu.dynamic_rotate %16 by %c2_i32 dim 0 : vector<32x128xf32>, i32 -> vector<32x128xf32>
    %c2_i32_7 = arith.constant 2 : i32
    %21 = vector.broadcast %c2_i32_7 : i32 to vector<32x128xi32>
    %22 = arith.cmpi sge, %18, %21 : vector<32x128xi32>
    %cst_8 = arith.constant 0.000000e+00 : f32
    %23 = vector.broadcast %cst_8 : f32 to vector<32x128xf32>
    %24 = arith.select %22, %20, %23 : vector<32x128xi1>, vector<32x128xf32>
    %25 = arith.truncf %24 : vector<32x128xf32> to vector<32x128xbf16>
    %c0_9 = arith.constant 0 : index
    %c0_10 = arith.constant 0 : index
    %26 = vector.load %arg2[%c0_9, %c0_10] : memref<640x256xbf16, #tpu.memory_space<vmem>>, vector<128x256xbf16>
    %cst_11 = arith.constant dense<0.000000e+00> : vector<32x256xf32>
    %27 = tpu.matmul %25, %26, %cst_11 {dimension_numbers = #tpu.dot_dimension_numbers<[1], [0], [0], [1], [0, 0, 1, 1], [], []>} : vector<32x128xbf16>, vector<128x256xbf16>, vector<32x256xf32> -> vector<32x256xf32>
    %28 = arith.addf %19, %27 : vector<32x256xf32>
    %c1_i32 = arith.constant 1 : i32
    %29 = tpu.dynamic_rotate %16 by %c1_i32 dim 0 : vector<32x128xf32>, i32 -> vector<32x128xf32>
    %c1_i32_12 = arith.constant 1 : i32
    %30 = vector.broadcast %c1_i32_12 : i32 to vector<32x128xi32>
    %31 = arith.cmpi sge, %18, %30 : vector<32x128xi32>
    %cst_13 = arith.constant 0.000000e+00 : f32
    %32 = vector.broadcast %cst_13 : f32 to vector<32x128xf32>
    %33 = arith.select %31, %29, %32 : vector<32x128xi1>, vector<32x128xf32>
    %34 = arith.truncf %33 : vector<32x128xf32> to vector<32x128xbf16>
    %c128 = arith.constant 128 : index
    %c0_14 = arith.constant 0 : index
    %35 = vector.load %arg2[%c128, %c0_14] : memref<640x256xbf16, #tpu.memory_space<vmem>>, vector<128x256xbf16>
    %cst_15 = arith.constant dense<0.000000e+00> : vector<32x256xf32>
    %36 = tpu.matmul %34, %35, %cst_15 {dimension_numbers = #tpu.dot_dimension_numbers<[1], [0], [0], [1], [0, 0, 1, 1], [], []>} : vector<32x128xbf16>, vector<128x256xbf16>, vector<32x256xf32> -> vector<32x256xf32>
    %37 = arith.addf %28, %36 : vector<32x256xf32>
    %38 = arith.truncf %16 : vector<32x128xf32> to vector<32x128xbf16>
    %c256 = arith.constant 256 : index
    %c0_16 = arith.constant 0 : index
    %39 = vector.load %arg2[%c256, %c0_16] : memref<640x256xbf16, #tpu.memory_space<vmem>>, vector<128x256xbf16>
    %cst_17 = arith.constant dense<0.000000e+00> : vector<32x256xf32>
    %40 = tpu.matmul %38, %39, %cst_17 {dimension_numbers = #tpu.dot_dimension_numbers<[1], [0], [0], [1], [0, 0, 1, 1], [], []>} : vector<32x128xbf16>, vector<128x256xbf16>, vector<32x256xf32> -> vector<32x256xf32>
    %41 = arith.addf %37, %40 : vector<32x256xf32>
    %c31_i32 = arith.constant 31 : i32
    %42 = tpu.dynamic_rotate %16 by %c31_i32 dim 0 : vector<32x128xf32>, i32 -> vector<32x128xf32>
    %c15_i32 = arith.constant 15 : i32
    %43 = vector.broadcast %c15_i32 : i32 to vector<32x128xi32>
    %44 = arith.cmpi slt, %18, %43 : vector<32x128xi32>
    %cst_18 = arith.constant 0.000000e+00 : f32
    %45 = vector.broadcast %cst_18 : f32 to vector<32x128xf32>
    %46 = arith.select %44, %42, %45 : vector<32x128xi1>, vector<32x128xf32>
    %47 = arith.truncf %46 : vector<32x128xf32> to vector<32x128xbf16>
    %c384 = arith.constant 384 : index
    %c0_19 = arith.constant 0 : index
    %48 = vector.load %arg2[%c384, %c0_19] : memref<640x256xbf16, #tpu.memory_space<vmem>>, vector<128x256xbf16>
    %cst_20 = arith.constant dense<0.000000e+00> : vector<32x256xf32>
    %49 = tpu.matmul %47, %48, %cst_20 {dimension_numbers = #tpu.dot_dimension_numbers<[1], [0], [0], [1], [0, 0, 1, 1], [], []>} : vector<32x128xbf16>, vector<128x256xbf16>, vector<32x256xf32> -> vector<32x256xf32>
    %50 = arith.addf %41, %49 : vector<32x256xf32>
    %c30_i32 = arith.constant 30 : i32
    %51 = tpu.dynamic_rotate %16 by %c30_i32 dim 0 : vector<32x128xf32>, i32 -> vector<32x128xf32>
    %c14_i32 = arith.constant 14 : i32
    %52 = vector.broadcast %c14_i32 : i32 to vector<32x128xi32>
    %53 = arith.cmpi slt, %18, %52 : vector<32x128xi32>
    %cst_21 = arith.constant 0.000000e+00 : f32
    %54 = vector.broadcast %cst_21 : f32 to vector<32x128xf32>
    %55 = arith.select %53, %51, %54 : vector<32x128xi1>, vector<32x128xf32>
    %56 = arith.truncf %55 : vector<32x128xf32> to vector<32x128xbf16>
    %c512 = arith.constant 512 : index
    %c0_22 = arith.constant 0 : index
    %57 = vector.load %arg2[%c512, %c0_22] : memref<640x256xbf16, #tpu.memory_space<vmem>>, vector<128x256xbf16>
    %cst_23 = arith.constant dense<0.000000e+00> : vector<32x256xf32>
    %58 = tpu.matmul %56, %57, %cst_23 {dimension_numbers = #tpu.dot_dimension_numbers<[1], [0], [0], [1], [0, 0, 1, 1], [], []>} : vector<32x128xbf16>, vector<128x256xbf16>, vector<32x256xf32> -> vector<32x256xf32>
    %59 = arith.addf %50, %58 : vector<32x256xf32>
    %60 = vector.broadcast %3 : vector<1x256xf32> to vector<32x256xf32>
    %61 = arith.mulf %59, %60 : vector<32x256xf32>
    %62 = vector.broadcast %4 : vector<1x256xf32> to vector<32x256xf32>
    %63 = arith.addf %61, %62 : vector<32x256xf32>
    %cst_24 = arith.constant 0.000000e+00 : f32
    %64 = vector.broadcast %cst_24 : f32 to vector<32x256xf32>
    %65 = arith.maximumf %63, %64 : vector<32x256xf32>
    %66 = tpu.iota {dimensions = array<i32: 1>} : vector<2x16x256xi32>
    %67 = vector.shape_cast %66 : vector<2x16x256xi32> to vector<32x256xi32>
    %cst_25 = arith.constant 0.000000e+00 : f32
    %68 = vector.broadcast %cst_25 : f32 to vector<32x128xf32>
    %c1_i32_26 = arith.constant 1 : i32
    %69 = tpu.dynamic_rotate %65 by %c1_i32_26 dim 0 : vector<32x256xf32>, i32 -> vector<32x256xf32>
    %c1_i32_27 = arith.constant 1 : i32
    %70 = vector.broadcast %c1_i32_27 : i32 to vector<32x256xi32>
    %71 = arith.cmpi sge, %67, %70 : vector<32x256xi32>
    %cst_28 = arith.constant 0.000000e+00 : f32
    %72 = vector.broadcast %cst_28 : f32 to vector<32x256xf32>
    %73 = arith.select %71, %69, %72 : vector<32x256xi1>, vector<32x256xf32>
    %74 = arith.truncf %73 : vector<32x256xf32> to vector<32x256xbf16>
    %c0_29 = arith.constant 0 : index
    %c0_30 = arith.constant 0 : index
    %75 = vector.load %arg3[%c0_29, %c0_30] : memref<768x128xbf16, #tpu.memory_space<vmem>>, vector<256x128xbf16>
    %cst_31 = arith.constant dense<0.000000e+00> : vector<32x128xf32>
    %76 = tpu.matmul %74, %75, %cst_31 {dimension_numbers = #tpu.dot_dimension_numbers<[1], [0], [0], [1], [0, 0, 1, 1], [], []>} : vector<32x256xbf16>, vector<256x128xbf16>, vector<32x128xf32> -> vector<32x128xf32>
    %77 = arith.addf %68, %76 : vector<32x128xf32>
    %78 = arith.truncf %65 : vector<32x256xf32> to vector<32x256xbf16>
    %c256_32 = arith.constant 256 : index
    %c0_33 = arith.constant 0 : index
    %79 = vector.load %arg3[%c256_32, %c0_33] : memref<768x128xbf16, #tpu.memory_space<vmem>>, vector<256x128xbf16>
    %cst_34 = arith.constant dense<0.000000e+00> : vector<32x128xf32>
    %80 = tpu.matmul %78, %79, %cst_34 {dimension_numbers = #tpu.dot_dimension_numbers<[1], [0], [0], [1], [0, 0, 1, 1], [], []>} : vector<32x256xbf16>, vector<256x128xbf16>, vector<32x128xf32> -> vector<32x128xf32>
    %81 = arith.addf %77, %80 : vector<32x128xf32>
    %c31_i32_35 = arith.constant 31 : i32
    %82 = tpu.dynamic_rotate %65 by %c31_i32_35 dim 0 : vector<32x256xf32>, i32 -> vector<32x256xf32>
    %c15_i32_36 = arith.constant 15 : i32
    %83 = vector.broadcast %c15_i32_36 : i32 to vector<32x256xi32>
    %84 = arith.cmpi slt, %67, %83 : vector<32x256xi32>
    %cst_37 = arith.constant 0.000000e+00 : f32
    %85 = vector.broadcast %cst_37 : f32 to vector<32x256xf32>
    %86 = arith.select %84, %82, %85 : vector<32x256xi1>, vector<32x256xf32>
    %87 = arith.truncf %86 : vector<32x256xf32> to vector<32x256xbf16>
    %c512_38 = arith.constant 512 : index
    %c0_39 = arith.constant 0 : index
    %88 = vector.load %arg3[%c512_38, %c0_39] : memref<768x128xbf16, #tpu.memory_space<vmem>>, vector<256x128xbf16>
    %cst_40 = arith.constant dense<0.000000e+00> : vector<32x128xf32>
    %89 = tpu.matmul %87, %88, %cst_40 {dimension_numbers = #tpu.dot_dimension_numbers<[1], [0], [0], [1], [0, 0, 1, 1], [], []>} : vector<32x256xbf16>, vector<256x128xbf16>, vector<32x128xf32> -> vector<32x128xf32>
    %90 = arith.addf %81, %89 : vector<32x128xf32>
    %91 = vector.broadcast %5 : vector<1x128xf32> to vector<32x128xf32>
    %92 = arith.mulf %90, %91 : vector<32x128xf32>
    %93 = vector.broadcast %6 : vector<1x128xf32> to vector<32x128xf32>
    %94 = arith.addf %92, %93 : vector<32x128xf32>
    %cst_41 = arith.constant 0.000000e+00 : f32
    %95 = vector.broadcast %cst_41 : f32 to vector<32x128xf32>
    %96 = arith.maximumf %94, %95 : vector<32x128xf32>
    %97 = tpu.iota {dimensions = array<i32: 1>} : vector<2x32xi32>
    %98 = tpu.iota {dimensions = array<i32: 0>} : vector<2x32xi32>
    %c16_i32 = arith.constant 16 : i32
    %99 = vector.broadcast %c16_i32 : i32 to vector<2x32xi32>
    %100 = arith.muli %98, %99 : vector<2x32xi32>
    %101 = arith.cmpi sge, %97, %100 : vector<2x32xi32>
    %c16_i32_42 = arith.constant 16 : i32
    %102 = vector.broadcast %c16_i32_42 : i32 to vector<2x32xi32>
    %103 = arith.addi %100, %102 : vector<2x32xi32>
    %104 = arith.cmpi slt, %97, %103 : vector<2x32xi32>
    %105 = arith.andi %101, %104 : vector<2x32xi1>
    %cst_43 = arith.constant 6.250000e-02 : f32
    %cst_44 = arith.constant 0.000000e+00 : f32
    %106 = vector.broadcast %cst_43 : f32 to vector<2x32xf32>
    %107 = vector.broadcast %cst_44 : f32 to vector<2x32xf32>
    %108 = arith.select %105, %106, %107 : vector<2x32xi1>, vector<2x32xf32>
    %109 = arith.truncf %108 : vector<2x32xf32> to vector<2x32xbf16>
    %110 = arith.truncf %96 : vector<32x128xf32> to vector<32x128xbf16>
    %cst_45 = arith.constant dense<0.000000e+00> : vector<2x128xf32>
    %111 = tpu.matmul %109, %110, %cst_45 {dimension_numbers = #tpu.dot_dimension_numbers<[1], [0], [0], [1], [0, 0, 1, 1], [], []>} : vector<2x32xbf16>, vector<32x128xbf16>, vector<2x128xf32> -> vector<2x128xf32>
    %112 = arith.truncf %111 : vector<2x128xf32> to vector<2x128xbf16>
    %c0_46 = arith.constant 0 : index
    %c0_47 = arith.constant 0 : index
    %113 = vector.load %arg4[%c0_46, %c0_47] : memref<128x3xbf16, #tpu.memory_space<vmem>>, vector<128x3xbf16>
    %cst_48 = arith.constant dense<0.000000e+00> : vector<2x3xf32>
    %114 = tpu.matmul %112, %113, %cst_48 {dimension_numbers = #tpu.dot_dimension_numbers<[1], [0], [0], [1], [0, 0, 1, 1], [], []>} : vector<2x128xbf16>, vector<128x3xbf16>, vector<2x3xf32> -> vector<2x3xf32>
    %115 = vector.broadcast %7 : vector<1x3xf32> to vector<2x3xf32>
    %116 = arith.addf %114, %115 : vector<2x3xf32>
    %c0_49 = arith.constant 0 : index
    %c0_50 = arith.constant 0 : index
    %117 = vector.load %arg6[%c0_49, %c0_50] : memref<2x3xf32, #tpu.memory_space<vmem>>, vector<2x3xf32>
    tpu.vector_store %arg6[%c0_49, %c0_50], %116 {strides = array<i32>} : memref<2x3xf32, #tpu.memory_space<vmem>>, vector<2x3xf32>,
    return
  }
}

</mosaic_0001>

<bundles_post_ra>
// kernel: prototype_fcn_forward.1
= control target key start
LH: loop header
LB: loop body
LE: loop exit
PB: predicated region body
PF: predicated region fallthrough
CT: control target
= control target key end

     0   :  { %11 = vsyncpa [#allocation3], 0  ;;  %s2875_s0 = inlined_call_operand.vmem [shape: bf16[32,32], index: 0, kind: input, shape index: {}]   ;;  %s2876_s1 = inlined_call_operand.vmem [shape: bf16[32,128], index: 1, kind: input, shape index: {}]   ;;  %s2877_s2 = inlined_call_operand.hbm [shape: bf16[640,256], index: 2, kind: input, shape index: {}]   ;;  %s2878_s3 = inlined_call_operand.hbm [shape: bf16[768,128], index: 3, kind: input, shape index: {}]   ;;  %s2879_s4 = inlined_call_operand.vmem [shape: bf16[128,3], index: 4, kind: input, shape index: {}]   ;;  %s2880_s5 = inlined_call_operand.vmem [shape: f32[8,256], index: 5, kind: input, shape index: {}]   ;;  %s2881_s6 = inlined_call_operand.hbm [shape: f32[2,3], index: 6, kind: output, shape index: {}]  }
   0x1   :  { %12 = vsyncpa [#allocation6], 0 }
   0x2   :  { %13 = vsyncpa [#allocation4], 0  ;;  %s2462_s21 = smov [#allocation2]   ;;  %s2390_s25 = scalar_lea.hbm %s2877_s2, 10240 }
   0x3   :  { %s23_s22 = sshll.u32 %s2462_s21, 4  ;;  %p2391_p0 = scmp.ne.s32.totalorder %s2877_s2, %s2390_s25  ;;  %s24_s22 = int_to_ptr.vmem [resolvable:$true] %s23_s22 }
   0x4   :  { %p2394_p1 = scmp.lt.u32.totalorder %s2390_s25, %s2877_s2 }
   0x6   :  { %p2396_p2 = pnand %p2394_p1, %p2391_p0 }
   0x8   :  { %2399 = shalt.err (!%p2396_p2)
}
   0x9   :  { %s2400_s30 = scalar_lea.vmem %s24_s22, 10240  ;;  %p2405_p4 = scmp.lt.s32.totalorder %s24_s22, %s24_s22 }
   0xa   :  { %p2401_p3 = scmp.ne.s32.totalorder %s24_s22, %s2400_s30  ;;  %p2406_p5 = scmp.lt.s32.totalorder %s2400_s30, %s2400_s30 }
   0xc   :  { %p2407_p6 = por %p2406_p5, %p2405_p4 }
   0xe   :  { %p2408_p7 = pnand %p2407_p6, %p2401_p3 }
  0x10   :  { %2411 = shalt.err (!%p2408_p7)
}
  0x11   :  { %s2463_s7 = smov 128   ;;  %s2464_s8 = smov 8  }
  0x12   :  { %29 = dma.hbm_to_vmem [thread:$0]  %s2877_s2, 10240, %s24_s22, [#allocation3], %s2463_s7, %s2463_s7, %s2464_s8  }
  0x13   :  { %s2465_s11 = smov [#allocation5]   ;;  %s2412_s15 = scalar_lea.hbm %s2878_s3, 6144 }
  0x14   :  { %s35_s12 = sshll.u32 %s2465_s11, 4  ;;  %p2413_p8 = scmp.ne.s32.totalorder %s2878_s3, %s2412_s15  ;;  %s36_s12 = int_to_ptr.vmem [resolvable:$true] %s35_s12 }
  0x15   :  { %p2416_p9 = scmp.lt.u32.totalorder %s2412_s15, %s2878_s3 }
  0x17   :  { %p2418_p10 = pnand %p2416_p9, %p2413_p8 }
  0x19   :  { %2421 = shalt.err (!%p2418_p10)
}
  0x1a   :  { %s2422_s20 = scalar_lea.vmem %s36_s12, 6144  ;;  %p2427_p12 = scmp.lt.s32.totalorder %s36_s12, %s36_s12 }
  0x1b   :  { %p2423_p11 = scmp.ne.s32.totalorder %s36_s12, %s2422_s20  ;;  %p2428_p13 = scmp.lt.s32.totalorder %s2422_s20, %s2422_s20 }
  0x1d   :  { %p2429_p0 = por %p2428_p13, %p2427_p12 }
  0x1f   :  { %p2430_p1 = pnand %p2429_p0, %p2423_p11 }
  0x21   :  { %2433 = shalt.err (!%p2430_p1)
}
  0x22   :  { %s2466_s2 = smov 64   ;;  %s2467_s21 = smov 4  }
  0x23   :  { %41 = dma.hbm_to_vmem [thread:$0]  %s2878_s3, 6144, %s36_s12, [#allocation6], %s2466_s2, %s2466_s2, %s2467_s21  }
  0x24   :  { %2456 = dma.done.wait [#allocation3], 10240  }
  0x25   :  { %2457 = vsyncadd [#allocation3], 4294957056 }
  0x26   :  { %2458 = dma.done.wait [#allocation6], 6144  }
  0x27   :  { %2459 = vsyncadd [#allocation6], 4294961152  ;;  %v2209_v0 = vld [vmem:[%s2876_s1] sm:$0xff]   ;;  %v2210_v1 = vld [vmem:[%s2876_s1 + $0x8] sm:$0xff]   ;;  %vm85_vm0 = vcmask 261120   ;;  %v2468_v21 = vmov 0   ;;  %v141_v22 = vlaneseq }
  0x28   :  { %2130 = vmatprep.subr.bf16.mxu0 %v2209_v0  ;;  %v2211_v2 = vld [vmem:[%s2875_s0] sm:$0xff]   ;;  %v2212_v5 = vld [vmem:[%s2875_s0 + $0x8] sm:$0xff]   ;;  %v2216_v6 = vld [vmem:[#allocation2 + $0x94] ss:$8 sps:$4 sm:$0xff]   ;;  %342 = vmatprep.mubr.bf16.mxu1 %v2468_v21  ;;  %vm2469_vm6 = vmmov 1   ;;  %vm2471_vm14 = vmmov 0  }
  0x29   :  { %2131 = vmatpush3.bf16.msra.mxu0 %v2209_v0  ;;  %2134 = vmatprep.mubr.msk.bf16.mxu0 %vm85_vm0, %v2211_v2  ;;  %v2213_v3 = vld [vmem:[#allocation2 + $0x84] ss:$8 sps:$4 sm:$0xff]   ;;  %v2215_v4 = vld [vmem:[#allocation2 + $0x80] ss:$8 sps:$4 sm:$0xff]   ;;  %v2218_v7 = vld [vmem:[#allocation2 + $0x90] ss:$8 sps:$4 sm:$0xff]  }
  0x2a   :  { %2132 = vmatprep.subr.bf16.mxu0 %v2210_v1  ;;  %310 = vmatprep.subr.bf16.mxu1 %v2213_v3  ;;  %v2219_v8 = vld [vmem:[#allocation2 + $0xa4] ss:$8 sps:$4 sm:$0xff]   ;;  %v2221_v9 = vld [vmem:[#allocation2 + $0xa0] ss:$8 sps:$4 sm:$0xff]   ;;  %v2222_v10 = vld [vmem:[#allocation2 + $0xb4] ss:$8 sps:$4 sm:$0xff]  }
  0x2b   :  { %311 = vmatpush1.bf16.msra.mxu1 %v2215_v4  ;;  %v2224_v11 = vld [vmem:[#allocation2 + $0xb0] ss:$8 sps:$4 sm:$0xff]   ;;  %v2225_v12 = vld [vmem:[#allocation2 + $0xc4] ss:$8 sps:$4 sm:$0xff]   ;;  %v2227_v13 = vld [vmem:[#allocation2 + $0xc0] ss:$8 sps:$4 sm:$0xff]  }
  0x2c   :  { %312 = vmatprep.subr.bf16.mxu1 %v2216_v6  ;;  %v2228_v14 = vld [vmem:[#allocation2 + $0xd4] ss:$8 sps:$4 sm:$0xff]   ;;  %v2230_v15 = vld [vmem:[#allocation2 + $0xd0] ss:$8 sps:$4 sm:$0xff]   ;;  %v2231_v16 = vld [vmem:[#allocation2 + $0xe4] ss:$8 sps:$4 sm:$0xff]  }
  0x2d   :  { %2133 = vmatpush3.bf16.msra.mxu0 %v2210_v1  ;;  %v2233_v17 = vld [vmem:[#allocation2 + $0xe0] ss:$8 sps:$4 sm:$0xff]   ;;  %v2234_v18 = vld [vmem:[#allocation2 + $0xf4] ss:$8 sps:$4 sm:$0xff]   ;;  %v2236_v19 = vld [vmem:[#allocation2 + $0xf0] ss:$8 sps:$4 sm:$0xff]  }
  0x2e   :  { %v2239_v20 = vld [vmem:[#allocation2 + $0x4] ss:$8 sps:$4 sm:$0xff]   ;;  %v2548_v23 = vshrl.u32 %v141_v22, 7  ;;  %v2237_v63 = vld [vmem:[#allocation2] ss:$8 sps:$4 sm:$0xff]   ;;  %v2379_v1 = vld [vmem:[#allocation5 + $0x178] sm:$0xff]  }
  0x2f   :  { %313 = vmatpush1.bf16.msra.mxu1 %v2218_v7  ;;  %v2554_v25 = vld [vmem:[%s2880_s5] sm:$0xff]  ;;  %v2242_v6 = vld [vmem:[#allocation2 + $0x14] ss:$8 sps:$4 sm:$0xff]   ;;  %s2472_s26 = smov [#allocation7]  }
  0x30   :  { %2135 = vmatmul.mubr.msk.bf16.vlgmr.msra.gmra.mrb[0].mxu0 %vm85_vm0, %v2212_v5  ;;  %314 = vmatprep.subr.bf16.mxu1 %v2219_v8  ;;  %v143_v24 = vsub.s32 0, %v2548_v23  ;;  %v151_v26 = vsub.s32 1, %v2548_v23  ;;  %vm201_vm1 = vcmp.lt.s32.totalorder %v2548_v23, 1  ;;  %vm168_vm2 = vcmp.lt.s32.totalorder %v2548_v23, 2  ;;  %s1829_s27 = sshll.u32 %s2472_s26, 4  ;;  %s1830_s27 = int_to_ptr.vmem [resolvable:$true] %s1829_s27 }
  0x31   :  { %vm206_vm3 = vcmp.ge.s32.totalorder %v2548_v23, 1  ;;  %vm659_vm4 = vcmp.lt.s32.totalorder %v2548_v23, 7  ;;  %vm833_vm5 = vcmp.lt.s32.totalorder %v2548_v23, 6  ;;  %vm173_vm8 = vcmp.ge.s32.totalorder %v2548_v23, 2  ;;  %p2439_p3 = scmp.lt.s32.totalorder %s1830_s27, %s1830_s27 }
  0x32   :  { %v144_v27 = vrot.slane %v2554_v25, %v143_v24  ;;  %v152_v28 = vrot.slane %v2554_v25, %v151_v26  ;;  %vm2603_vm7 = vmpackc.low %vm2469_vm6, %vm206_vm3  ;;  %v2245_v24 = vld [vmem:[#allocation2 + $0x24] ss:$8 sps:$4 sm:$0xff]  }
  0x33   :  { %315 = vmatpush1.bf16.msra.mxu1 %v2221_v9  ;;  %vm1883_vm9 = vmpackc.low %vm2469_vm6, %vm173_vm8 }
  0x34   :  { %316 = vmatprep.subr.bf16.mxu1 %v2222_v10 }
  0x37   :  { %317 = vmatpush1.bf16.msra.mxu1 %v2224_v11 }
  0x38   :  { %318 = vmatprep.subr.bf16.mxu1 %v2225_v12 }
  0x3b   :  { %319 = vmatpush1.bf16.msra.mxu1 %v2227_v13 }
  0x3c   :  { %320 = vmatprep.subr.bf16.mxu1 %v2228_v14 }
  0x3f   :  { %321 = vmatpush1.bf16.msra.mxu1 %v2230_v15 }
  0x40   :  { %322 = vmatprep.subr.bf16.mxu1 %v2231_v16 }
  0x43   :  { %323 = vmatpush1.bf16.msra.mxu1 %v2233_v17 }
  0x44   :  { %324 = vmatprep.subr.bf16.mxu1 %v2234_v18  ;;  %v2240_v18 = vld [vmem:[#allocation2 + $0x10] ss:$8 sps:$4 sm:$0xff]  }
  0x47   :  { %325 = vmatpush1.bf16.msra.mxu1 %v2236_v19 }
  0x48   :  { %443 = vmatprep.subr.bf16.mxu1 %v2239_v20 }
 0x103   :  { %v2136_v29 = vpop.f32.mrb[0].mxu0 }
 0x104   :  { %v147_v30 = vmul.f32 %v2136_v29, %v144_v27  ;;  %v126_v31 = vpop.f32.mrb[1].mxu0 }
 0x105   :  { %v145_v32 = vmul.f32 %v144_v27, %v126_v31  ;;  %v2137_v33 = vpop.f32.mrb[2].mxu0 }
 0x106   :  { %v155_v34 = vadd.f32 %v152_v28, %v147_v30  ;;  %v148_v35 = vmul.f32 %v2137_v33, %v144_v27  ;;  %v129_v36 = vpop.f32.mrb[3].mxu0  ;;  %v2248_v33 = vld [vmem:[#allocation2 + $0x34] ss:$8 sps:$4 sm:$0xff]  }
 0x107   :  { %v153_v37 = vadd.f32 %v152_v28, %v145_v32  ;;  %v146_v38 = vmul.f32 %v144_v27, %v129_v36  ;;  %v2243_v32 = vld [vmem:[#allocation2 + $0x20] ss:$8 sps:$4 sm:$0xff]  }
 0x108   :  { %v2561_v39 = vmax.f32 %v155_v34, 0.0  ;;  %v156_v40 = vadd.f32 %v152_v28, %v148_v35  ;;  %v2333_v34 = vld [vmem:[#allocation5 + $0xc0] sm:$0xff]   ;;  %v2335_v36 = vld [vmem:[#allocation5 + $0xc8] sm:$0xff]  }
 0x109   :  { %v2564_v41 = vmax.f32 %v153_v37, 0.0  ;;  %v154_v42 = vadd.f32 %v152_v28, %v146_v38  ;;  %v2334_v35 = vld [vmem:[#allocation5 + $0x80] sm:$0xff]   ;;  %v2246_v37 = vld [vmem:[#allocation2 + $0x30] ss:$8 sps:$4 sm:$0xff]   ;;  %2034 = vmatprep.subr.bf16.mxu0 %v2333_v34  ;;  %v2296_v34 = vld [vmem:[#allocation2 + $0x1b4] ss:$8 sps:$4 sm:$0xff]  }
 0x10a   :  { %v657_v43 = vrot.slane %v2561_v39, 1  ;;  %v831_v44 = vrot.slane %v2561_v39, 2  ;;  %v2570_v45 = vmax.f32 %v156_v40, 0.0  ;;  %v199_v46 = vrot.slane %v2561_v39, 7  ;;  %v2251_v38 = vld [vmem:[#allocation2 + $0x44] ss:$8 sps:$4 sm:$0xff]   ;;  %2035 = vmatpush3.bf16.msra.mxu0 %v2334_v35 }
 0x10b   :  { %v164_v47 = vrot.slane %v2564_v41, 6  ;;  %v655_v48 = vrot.slane %v2564_v41, 1  ;;  %v829_v49 = vrot.slane %v2564_v41, 2  ;;  %v2576_v50 = vmax.f32 %v154_v42, 0.0  ;;  %v2336_v40 = vld [vmem:[#allocation5 + $0x88] sm:$0xff]   ;;  %2036 = vmatprep.subr.bf16.mxu0 %v2335_v36  ;;  %v2337_v42 = vld [vmem:[#allocation5 + $0xd0] sm:$0xff]  }
 0x10c   :  { %v167_v51 = vrot.slane %v2570_v45, 6  ;;  %v197_v52 = vrot.slane %v2564_v41, 7  ;;  %v200_v53 = vrot.slane %v2570_v45, 7  ;;  %v166_v54 = vrot.slane %v2561_v39, 6  ;;  %v2294_v35 = vld [vmem:[#allocation2 + $0x1b0] ss:$8 sps:$4 sm:$0xff]  }
 0x10d   :  { %v165_v55 = vrot.slane %v2576_v50, 6  ;;  %v656_v56 = vrot.slane %v2576_v50, 1  ;;  %v830_v57 = vrot.slane %v2576_v50, 2  ;;  %v198_v58 = vrot.slane %v2576_v50, 7  ;;  %v2300_v36 = vld [vmem:[#allocation2 + $0x1d0] ss:$8 sps:$4 sm:$0xff]  }
 0x10e   :  { %v205_v59 = vsel %vm201_vm1, %v200_v53, %v197_v52  ;;  %v202_v60 = vsel %vm201_vm1, %v199_v46, %v200_v53  ;;  %v2592_v61 = vsel %vm168_vm2, %v167_v51, %v164_v47  ;;  %v2596_v62 = vsel %vm168_vm2, %v166_v54, %v167_v51  ;;  %2037 = vmatpush3.bf16.msra.mxu0 %v2336_v40  ;;  %v2340_v51 = vld [vmem:[#allocation5 + $0x98] sm:$0xff]   ;;  %v2255_v53 = vld [vmem:[#allocation2 + $0x60] ss:$8 sps:$4 sm:$0xff]  }
 0x10f   :  { %v204_v0 = vsel %vm201_vm1, %v197_v52, %v198_v58  ;;  %v203_v2 = vsel %vm201_vm1, %v198_v58, %v199_v46  ;;  %v2611_v3 = vsel %vm168_vm2, %v164_v47, %v165_v55  ;;  %v2615_v4 = vsel %vm168_vm2, %v165_v55, %v166_v54  ;;  %v2338_v46 = vld [vmem:[#allocation5 + $0x90] sm:$0xff]   ;;  %2038 = vmatprep.subr.bf16.mxu0 %v2337_v42  ;;  %v2339_v47 = vld [vmem:[#allocation5 + $0xd8] sm:$0xff]   ;;  %v2341_v52 = vld [vmem:[#allocation5 + $0xe0] sm:$0xff]  }
 0x110   :  { %v1862_v5 = vpack.c.bf16 %v204_v0, %v205_v59  ;;  %v1865_v7 = vpack.c.bf16 %v202_v60, %v203_v2  ;;  %v1884_v8 = vpack.c.bf16 %v2611_v3, %v2592_v61  ;;  %v1887_v9 = vpack.c.bf16 %v2596_v62, %v2615_v4  ;;  %v2260_v54 = vld [vmem:[#allocation2 + $0x74] ss:$8 sps:$4 sm:$0xff]   ;;  %v2342_v55 = vld [vmem:[#allocation5 + $0xa0] sm:$0xff]   ;;  %v2264_v60 = vld [vmem:[#allocation2 + $0x110] ss:$8 sps:$4 sm:$0xff]  }
 0x111   :  { %v496_v10 = vpack.c.bf16 %v2576_v50, %v2564_v41  ;;  %v497_v11 = vpack.c.bf16 %v2570_v45, %v2561_v39  ;;  %v2627_v12 = vsel %vm659_vm4, %v656_v56, %v657_v43  ;;  %v2631_v13 = vsel %vm659_vm4, %v655_v48, %v656_v56  ;;  %v2258_v56 = vld [vmem:[#allocation2 + $0x70] ss:$8 sps:$4 sm:$0xff]   ;;  %v2261_v58 = vld [vmem:[#allocation2 + $0x100] ss:$8 sps:$4 sm:$0xff]   ;;  %v2266_v59 = vld [vmem:[#allocation2 + $0x114] ss:$8 sps:$4 sm:$0xff]  }
 0x112   :  { %1863 = vmatmul.mubr.msk.bf16.vlgmr.msra.gmra.mrb[0].mxu1 %vm2603_vm7, %v1862_v5  ;;  %v1922_v14 = vpack.c.bf16 %v2627_v12, %v2631_v13  ;;  %v658_v15 = vrot.slane %v2570_v45, 1  ;;  %v2640_v16 = vsel %vm833_vm5, %v830_v57, %v831_v44  ;;  %v2644_v17 = vsel %vm833_vm5, %v829_v49, %v830_v57  ;;  %2039 = vmatpush3.bf16.msra.mxu0 %v2338_v46  ;;  %v2263_v57 = vld [vmem:[#allocation2 + $0x104] ss:$8 sps:$4 sm:$0xff]   ;;  %v2267_v0 = vld [vmem:[#allocation2 + $0x120] ss:$8 sps:$4 sm:$0xff]  }
 0x113   :  { %444 = vmatpush1.bf16.msra.mxu1 %v2237_v63  ;;  %352 = vmatprep.mubr.bf16.mxu1 %v2468_v21  ;;  %v1944_v19 = vpack.c.bf16 %v2640_v16, %v2644_v17  ;;  %v832_v20 = vrot.slane %v2570_v45, 2  ;;  %v2269_v63 = vld [vmem:[#allocation2 + $0x124] ss:$8 sps:$4 sm:$0xff]   ;;  %v2272_v2 = vld [vmem:[#allocation2 + $0x134] ss:$8 sps:$4 sm:$0xff]   ;;  %v163_v39 = vadd.s32 8, %v2548_v23 }
 0x114   :  { %445 = vmatprep.subr.bf16.mxu1 %v2242_v6  ;;  %v2652_v26 = vsel %vm659_vm4, %v657_v43, %v658_v15  ;;  %v2656_v27 = vsel %vm659_vm4, %v658_v15, %v655_v48  ;;  %v2249_v43 = vld [vmem:[#allocation2 + $0x40] ss:$8 sps:$4 sm:$0xff]   ;;  %v2252_v48 = vld [vmem:[#allocation2 + $0x50] ss:$8 sps:$4 sm:$0xff]   ;;  %2040 = vmatprep.subr.bf16.mxu0 %v2339_v47  ;;  %v2275_v61 = vld [vmem:[#allocation2 + $0x144] ss:$8 sps:$4 sm:$0xff]  }
 0x115   :  { %v1925_v28 = vpack.c.bf16 %v2656_v27, %v2652_v26  ;;  %v2662_v29 = vsel %vm833_vm5, %v831_v44, %v832_v20  ;;  %v2666_v30 = vsel %vm833_vm5, %v832_v20, %v829_v49  ;;  %v2254_v44 = vld [vmem:[#allocation2 + $0x54] ss:$8 sps:$4 sm:$0xff]   ;;  %v2257_v49 = vld [vmem:[#allocation2 + $0x64] ss:$8 sps:$4 sm:$0xff]   ;;  %v2270_v5 = vld [vmem:[#allocation2 + $0x130] ss:$8 sps:$4 sm:$0xff]  }
 0x116   :  { %v1947_v31 = vpack.c.bf16 %v2666_v30, %v2662_v29  ;;  %2041 = vmatpush3.bf16.msra.mxu0 %v2340_v51  ;;  %v2273_v3 = vld [vmem:[#allocation2 + $0x140] ss:$8 sps:$4 sm:$0xff]   ;;  %v2278_v6 = vld [vmem:[#allocation2 + $0x154] ss:$8 sps:$4 sm:$0xff]   ;;  %v2282_v62 = vld [vmem:[#allocation2 + $0x170] ss:$8 sps:$4 sm:$0xff]  }
 0x117   :  { %446 = vmatpush1.bf16.msra.mxu1 %v2240_v18  ;;  %2042 = vmatprep.subr.bf16.mxu0 %v2341_v52  ;;  %v2279_v15 = vld [vmem:[#allocation2 + $0x160] ss:$8 sps:$4 sm:$0xff]   ;;  %v2284_v18 = vld [vmem:[#allocation2 + $0x174] ss:$8 sps:$4 sm:$0xff]   ;;  %v2287_v4 = vld [vmem:[#allocation2 + $0x184] ss:$8 sps:$4 sm:$0xff]  }
 0x118   :  { %447 = vmatprep.subr.bf16.mxu1 %v2245_v24  ;;  %v2290_v20 = vld [vmem:[#allocation2 + $0x194] ss:$8 sps:$4 sm:$0xff]   ;;  %v2288_v24 = vld [vmem:[#allocation2 + $0x190] ss:$8 sps:$4 sm:$0xff]   ;;  %v2299_v41 = vld [vmem:[#allocation2 + $0x1c4] ss:$8 sps:$4 sm:$0xff]  }
 0x119   :  { %v2297_v50 = vld [vmem:[#allocation2 + $0x1c0] ss:$8 sps:$4 sm:$0xff]   ;;  %v2308_v40 = vld [vmem:[#allocation2 + $0x1f4] ss:$8 sps:$4 sm:$0xff]   ;;  %v2306_v45 = vld [vmem:[#allocation2 + $0x1f0] ss:$8 sps:$4 sm:$0xff]  }
 0x11a   :  { %1866 = vmatmul.mubr.msk.bf16.gmra.mrb[4].mxu1 %vm2603_vm7, %v1865_v7  ;;  %2043 = vmatpush3.bf16.msra.mxu0 %v2342_v55  ;;  %v2276_v7 = vld [vmem:[#allocation2 + $0x150] ss:$8 sps:$4 sm:$0xff]   ;;  %vm665_vm10 = vcmp.lt.s32.totalorder %v163_v39, 15  ;;  %v2317_v47 = vld [vmem:[#allocation2 + $0x224] ss:$8 sps:$4 sm:$0xff]   ;;  %vm839_vm12 = vcmp.lt.s32.totalorder %v163_v39, 14 }
 0x11b   :  { %448 = vmatpush1.bf16.msra.mxu1 %v2243_v32  ;;  %475 = vmatprep.mubr.bf16.mxu1 %v2468_v21  ;;  %v2293_v32 = vld [vmem:[#allocation2 + $0x1a4] ss:$8 sps:$4 sm:$0xff]   ;;  %vm2693_vm11 = vmpackc.low %vm665_vm10, %vm2469_vm6  ;;  %v2312_v46 = vld [vmem:[#allocation2 + $0x210] ss:$8 sps:$4 sm:$0xff]   ;;  %v1021_v17 = vsub.s32 3, %v2548_v23 }
 0x11c   :  { %449 = vmatprep.subr.bf16.mxu1 %v2248_v33  ;;  %v2291_v33 = vld [vmem:[#allocation2 + $0x1a0] ss:$8 sps:$4 sm:$0xff]   ;;  %v2318_v12 = vld [vmem:[#allocation2 + $0x230] ss:$8 sps:$4 sm:$0xff]   ;;  %v2323_v13 = vld [vmem:[#allocation2 + $0x244] ss:$8 sps:$4 sm:$0xff]  }
 0x11d   :  { %v2326_v51 = vld [vmem:[#allocation2 + $0x254] ss:$8 sps:$4 sm:$0xff]   ;;  %v2324_v52 = vld [vmem:[#allocation2 + $0x250] ss:$8 sps:$4 sm:$0xff]   ;;  %vm1943_vm13 = vmpackc.low %vm839_vm12, %vm2469_vm6 }
 0x11e   :  { %v2332_v26 = vld [vmem:[#allocation2 + $0x274] ss:$8 sps:$4 sm:$0xff]   ;;  %v2330_v27 = vld [vmem:[#allocation2 + $0x270] ss:$8 sps:$4 sm:$0xff]   ;;  %v2344_v55 = vld [vmem:[#allocation5 + $0xa8] sm:$0xff]  }
 0x11f   :  { %450 = vmatpush1.bf16.msra.mxu1 %v2246_v37  ;;  %v2305_v37 = vld [vmem:[#allocation2 + $0x1e4] ss:$8 sps:$4 sm:$0xff]  }
 0x120   :  { %451 = vmatprep.subr.bf16.mxu1 %v2251_v38  ;;  %v2303_v38 = vld [vmem:[#allocation2 + $0x1e0] ss:$8 sps:$4 sm:$0xff]  }
 0x121   :  { %v2349_v16 = vld [vmem:[#allocation5 + $0x40] sm:$0xff]  }
 0x123   :  { %452 = vmatpush1.bf16.msra.mxu1 %v2249_v43  ;;  %v2309_v43 = vld [vmem:[#allocation2 + $0x200] ss:$8 sps:$4 sm:$0xff]  }
 0x124   :  { %453 = vmatprep.subr.bf16.mxu1 %v2254_v44  ;;  %v2314_v44 = vld [vmem:[#allocation2 + $0x214] ss:$8 sps:$4 sm:$0xff]  }
 0x127   :  { %454 = vmatpush1.bf16.msra.mxu1 %v2252_v48  ;;  %v2315_v48 = vld [vmem:[#allocation2 + $0x220] ss:$8 sps:$4 sm:$0xff]  }
 0x128   :  { %455 = vmatprep.subr.bf16.mxu1 %v2257_v49  ;;  %v2320_v49 = vld [vmem:[#allocation2 + $0x234] ss:$8 sps:$4 sm:$0xff]  }
 0x12b   :  { %456 = vmatpush1.bf16.msra.mxu1 %v2255_v53  ;;  %v2329_v53 = vld [vmem:[#allocation2 + $0x264] ss:$8 sps:$4 sm:$0xff]  }
 0x12c   :  { %457 = vmatprep.subr.bf16.mxu1 %v2260_v54  ;;  %v2327_v54 = vld [vmem:[#allocation2 + $0x260] ss:$8 sps:$4 sm:$0xff]  }
 0x12f   :  { %458 = vmatpush1.bf16.msra.mxu1 %v2258_v56  ;;  %v2345_v56 = vld [vmem:[#allocation5 + $0xf0] sm:$0xff]  }
 0x130   :  { %594 = vmatprep.subr.bf16.mxu1 %v2263_v57  ;;  %v2346_v57 = vld [vmem:[#allocation5 + $0xb0] sm:$0xff]  }
 0x132   :  { %1885 = vmatmul.mubr.msk.bf16.vlgmr.msra.gmra.mrb[0].mxu1 %vm1883_vm9, %v1884_v8  ;;  %v2281_v8 = vld [vmem:[#allocation2 + $0x164] ss:$8 sps:$4 sm:$0xff]  }
 0x133   :  { %595 = vmatpush1.bf16.msra.mxu1 %v2261_v58  ;;  %485 = vmatprep.mubr.bf16.mxu1 %v2468_v21  ;;  %v2347_v58 = vld [vmem:[#allocation5 + $0xf8] sm:$0xff]  }
 0x134   :  { %596 = vmatprep.subr.bf16.mxu1 %v2266_v59  ;;  %v2348_v59 = vld [vmem:[#allocation5 + $0xb8] sm:$0xff]  }
 0x137   :  { %597 = vmatpush1.bf16.msra.mxu1 %v2264_v60 }
 0x138   :  { %598 = vmatprep.subr.bf16.mxu1 %v2269_v63 }
 0x13a   :  { %1888 = vmatmul.mubr.msk.bf16.gmra.mrb[4].mxu1 %vm1883_vm9, %v1887_v9  ;;  %v2285_v9 = vld [vmem:[#allocation2 + $0x180] ss:$8 sps:$4 sm:$0xff]  }
 0x13b   :  { %599 = vmatpush1.bf16.msra.mxu1 %v2267_v0  ;;  %626 = vmatprep.mubr.bf16.mxu1 %v2468_v21 }
 0x13c   :  { %600 = vmatprep.subr.bf16.mxu1 %v2272_v2 }
 0x13f   :  { %601 = vmatpush1.bf16.msra.mxu1 %v2270_v5 }
 0x140   :  { %602 = vmatprep.subr.bf16.mxu1 %v2275_v61 }
 0x143   :  { %603 = vmatpush1.bf16.msra.mxu1 %v2273_v3 }
 0x144   :  { %604 = vmatprep.subr.bf16.mxu1 %v2278_v6 }
 0x147   :  { %605 = vmatpush1.bf16.msra.mxu1 %v2276_v7 }
 0x148   :  { %606 = vmatprep.subr.bf16.mxu1 %v2281_v8 }
 0x14b   :  { %607 = vmatpush1.bf16.msra.mxu1 %v2279_v15 }
 0x14c   :  { %608 = vmatprep.subr.bf16.mxu1 %v2284_v18 }
 0x14f   :  { %609 = vmatpush1.bf16.msra.mxu1 %v2282_v62 }
 0x150   :  { %768 = vmatprep.subr.bf16.mxu1 %v2287_v4 }
 0x152   :  { %627 = vmatmul.mubr.bf16.vlgmr.msra.gmra.mrb[0].mxu1 %v496_v10  ;;  %v2302_v10 = vld [vmem:[#allocation2 + $0x1d4] ss:$8 sps:$4 sm:$0xff]  }
 0x153   :  { %769 = vmatpush1.bf16.msra.mxu1 %v2285_v9  ;;  %636 = vmatprep.mubr.bf16.mxu1 %v2468_v21 }
 0x154   :  { %770 = vmatprep.subr.bf16.mxu1 %v2290_v20 }
 0x157   :  { %771 = vmatpush1.bf16.msra.mxu1 %v2288_v24 }
 0x158   :  { %772 = vmatprep.subr.bf16.mxu1 %v2293_v32 }
 0x15a   :  { %637 = vmatmul.mubr.bf16.gmra.mrb[4].mxu1 %v497_v11  ;;  %v2311_v11 = vld [vmem:[#allocation2 + $0x204] ss:$8 sps:$4 sm:$0xff]  }
 0x15b   :  { %773 = vmatpush1.bf16.msra.mxu1 %v2291_v33  ;;  %800 = vmatprep.mubr.bf16.mxu1 %v2468_v21 }
 0x15c   :  { %774 = vmatprep.subr.bf16.mxu1 %v2296_v34 }
 0x15f   :  { %775 = vmatpush1.bf16.msra.mxu1 %v2294_v35 }
 0x160   :  { %776 = vmatprep.subr.bf16.mxu1 %v2299_v41 }
 0x163   :  { %777 = vmatpush1.bf16.msra.mxu1 %v2297_v50 }
 0x164   :  { %778 = vmatprep.subr.bf16.mxu1 %v2302_v10 }
 0x167   :  { %779 = vmatpush1.bf16.msra.mxu1 %v2300_v36 }
 0x168   :  { %780 = vmatprep.subr.bf16.mxu1 %v2305_v37 }
 0x16b   :  { %781 = vmatpush1.bf16.msra.mxu1 %v2303_v38 }
 0x16c   :  { %782 = vmatprep.subr.bf16.mxu1 %v2308_v40 }
 0x16f   :  { %783 = vmatpush1.bf16.msra.mxu1 %v2306_v45 }
 0x170   :  { %942 = vmatprep.subr.bf16.mxu1 %v2311_v11 }
 0x172   :  { %1923 = vmatmul.mubr.msk.bf16.vlgmr.msra.gmra.mrb[0].mxu1 %vm2693_vm11, %v1922_v14  ;;  %v2321_v14 = vld [vmem:[#allocation2 + $0x240] ss:$8 sps:$4 sm:$0xff]  }
 0x173   :  { %943 = vmatpush1.bf16.msra.mxu1 %v2309_v43  ;;  %810 = vmatprep.mubr.bf16.mxu1 %v2468_v21 }
 0x174   :  { %944 = vmatprep.subr.bf16.mxu1 %v2314_v44  ;;  %v2350_v44 = vld [vmem:[#allocation5] sm:$0xff]  }
 0x177   :  { %945 = vmatpush1.bf16.msra.mxu1 %v2312_v46 }
 0x178   :  { %946 = vmatprep.subr.bf16.mxu1 %v2317_v47 }
 0x17a   :  { %1926 = vmatmul.mubr.msk.bf16.gmra.mrb[4].mxu1 %vm2693_vm11, %v1925_v28  ;;  %v2343_v28 = vld [vmem:[#allocation5 + $0xe8] sm:$0xff]  }
 0x17b   :  { %947 = vmatpush1.bf16.msra.mxu1 %v2315_v48  ;;  %974 = vmatprep.mubr.bf16.mxu1 %v2468_v21 }
 0x17c   :  { %948 = vmatprep.subr.bf16.mxu1 %v2320_v49  ;;  %2044 = vmatprep.subr.bf16.mxu0 %v2343_v28 }
 0x17d   :  { %2045 = vmatpush3.bf16.msra.mxu0 %v2344_v55  ;;  %v2352_v55 = vld [vmem:[#allocation5 + $0x8] sm:$0xff]  }
 0x17e   :  { %2046 = vmatprep.subr.bf16.mxu0 %v2345_v56 }
 0x17f   :  { %949 = vmatpush1.bf16.msra.mxu1 %v2318_v12 }
 0x180   :  { %950 = vmatprep.subr.bf16.mxu1 %v2323_v13  ;;  %v2351_v13 = vld [vmem:[#allocation5 + $0x48] sm:$0xff]  }
 0x181   :  { %2047 = vmatpush3.bf16.msra.mxu0 %v2346_v57 }
 0x182   :  { %2048 = vmatprep.subr.bf16.mxu0 %v2347_v58 }
 0x183   :  { %951 = vmatpush1.bf16.msra.mxu1 %v2321_v14 }
 0x184   :  { %952 = vmatprep.subr.bf16.mxu1 %v2326_v51 }
 0x185   :  { %2049 = vmatpush3.bf16.msra.mxu0 %v2348_v59  ;;  %v2353_v59 = vld [vmem:[#allocation5 + $0x50] sm:$0xff]  }
 0x186   :  { %2062 = vmatprep.subr.bf16.mxu0 %v2349_v16 }
 0x187   :  { %953 = vmatpush1.bf16.msra.mxu1 %v2324_v52 }
 0x188   :  { %954 = vmatprep.subr.bf16.mxu1 %v2329_v53 }
 0x18b   :  { %955 = vmatpush1.bf16.msra.mxu1 %v2327_v54 }
 0x18c   :  { %956 = vmatprep.subr.bf16.mxu1 %v2332_v26 }
 0x18f   :  { %957 = vmatpush1.bf16.msra.mxu1 %v2330_v27 }
 0x192   :  { %1945 = vmatmul.mubr.msk.bf16.vlgmr.msra.gmra.mrb[0].mxu1 %vm1943_vm13, %v1944_v19  ;;  %v54_v19 = vld [vmem:[%s2880_s5 + $0x8] sm:$0xff] }
 0x193   :  { %984 = vmatprep.mubr.bf16.mxu1 %v2468_v21  ;;  %v1005_v21 = vsub.s32 2, %v2548_v23  ;;  %v1026_v63 = vrot.slane %v54_v19, %v1021_v17 }
 0x195   :  { %v1006_v29 = vrot.slane %v2554_v25, %v1005_v21  ;;  %v1010_v30 = vrot.slane %v54_v19, %v1005_v21 }
 0x19a   :  { %1948 = vmatmul.mubr.msk.bf16.gmra.mrb[4].mxu1 %vm1943_vm13, %v1947_v31  ;;  %v1022_v31 = vrot.slane %v2554_v25, %v1021_v17 }
 0x265   :  { %v976_v60 = vpop.f32.mrb[0].mxu1 }
 0x266   :  { %v1011_v0 = vmul.f32 %v1006_v29, %v976_v60  ;;  %v978_v2 = vpop.f32.mrb[1].mxu1 }
 0x267   :  { %v1012_v5 = vmul.f32 %v1010_v30, %v978_v2  ;;  %v980_v61 = vpop.f32.mrb[2].mxu1 }
 0x268   :  { %v1027_v3 = vadd.f32 %v1022_v31, %v1011_v0  ;;  %v1013_v6 = vmul.f32 %v1006_v29, %v980_v61  ;;  %v982_v7 = vpop.f32.mrb[3].mxu1 }
 0x269   :  { %v1028_v8 = vadd.f32 %v1026_v63, %v1012_v5  ;;  %v1014_v15 = vmul.f32 %v1010_v30, %v982_v7  ;;  %v2354_v5 = vld [vmem:[#allocation5 + $0x10] sm:$0xff]  }
 0x26a   :  { %v2724_v18 = vmax.f32 %v1027_v3, 0.0  ;;  %v1029_v62 = vadd.f32 %v1022_v31, %v1013_v6  ;;  %v2355_v3 = vld [vmem:[#allocation5 + $0x58] sm:$0xff]  }
 0x26b   :  { %v2726_v4 = vmax.f32 %v1028_v8, 0.0  ;;  %v1030_v9 = vadd.f32 %v1026_v63, %v1014_v15 }
 0x26c   :  { %v1043_v20 = vrot.slane %v2724_v18, 7  ;;  %v1037_v24 = vmax.f32 %v1029_v62, 0.0  ;;  %v1429_v32 = vrot.slane %v2724_v18, 1 }
 0x26d   :  { %v1044_v33 = vrot.slane %v2726_v4, 7  ;;  %v1430_v34 = vrot.slane %v2726_v4, 1  ;;  %v2732_v35 = vmax.f32 %v1030_v9, 0.0  ;;  %v986_v41 = vpop.f32.mrb[4].mxu1 }
 0x26e   :  { %v1045_v50 = vrot.slane %v1037_v24, 7  ;;  %v1431_v10 = vrot.slane %v1037_v24, 1  ;;  %v1015_v36 = vmul.f32 %v1006_v29, %v986_v41  ;;  %v988_v37 = vpop.f32.mrb[5].mxu1  ;;  %v1103_v38 = vpack.c.bf16 %v1037_v24, %v2724_v18  ;;  %v2362_v18 = vld [vmem:[#allocation5 + $0x30] sm:$0xff]  }
 0x26f   :  { %v1046_v40 = vrot.slane %v2732_v35, 7  ;;  %v1432_v39 = vrot.slane %v2732_v35, 1  ;;  %v1016_v45 = vmul.f32 %v1010_v30, %v988_v37  ;;  %v990_v11 = vpop.f32.mrb[6].mxu1  ;;  %v1104_v43 = vpack.c.bf16 %v2732_v35, %v2726_v4  ;;  %v2358_v4 = vld [vmem:[#allocation5 + $0x20] sm:$0xff]  }
 0x270   :  { %v2741_v46 = vsel %vm201_vm1, %v1043_v20, %v1045_v50  ;;  %v2747_v47 = vsel %vm659_vm4, %v1429_v32, %v1431_v10  ;;  %v1031_v48 = vadd.f32 %v1022_v31, %v1015_v36  ;;  %v1017_v49 = vmul.f32 %v1006_v29, %v990_v11  ;;  %v992_v12 = vpop.f32.mrb[7].mxu1  ;;  %v2360_v11 = vld [vmem:[#allocation5 + $0x28] sm:$0xff]  }
 0x271   :  { %v1032_v14 = vadd.f32 %v1026_v63, %v1016_v45  ;;  %v1018_v51 = vmul.f32 %v1010_v30, %v992_v12  ;;  %1267 = vmatprep.mubr.bf16.mxu0 %v1104_v43  ;;  %v1056_v52 = vsel %vm201_vm1, %v1044_v33, %v1046_v40  ;;  %v2755_v53 = vsel %vm659_vm4, %v1430_v34, %v1432_v39  ;;  %v2361_v43 = vld [vmem:[#allocation5 + $0x70] sm:$0xff]   ;;  %v2368_v12 = vld [vmem:[#allocation5 + $0x108] sm:$0xff]  }
 0x272   :  { %v1039_v54 = vmax.f32 %v1031_v48, 0.0  ;;  %v1033_v26 = vadd.f32 %v1022_v31, %v1017_v49  ;;  %1268 = vmatmul.mubr.bf16.vlgmr.msra.gmra.mrb[4].mxu0 %v1103_v38  ;;  %v2366_v48 = vld [vmem:[#allocation5 + $0x100] sm:$0xff]   ;;  %v2367_v49 = vld [vmem:[#allocation5 + $0x148] sm:$0xff]  }
 0x273   :  { %v1040_v27 = vmax.f32 %v1032_v14, 0.0  ;;  %v1034_v28 = vadd.f32 %v1026_v63, %v1018_v51  ;;  %2063 = vmatpush3.bf16.msra.mxu0 %v2350_v44  ;;  %v2364_v44 = vld [vmem:[#allocation5 + $0x38] sm:$0xff]   ;;  %v2370_v14 = vld [vmem:[#allocation5 + $0x110] sm:$0xff]  }
 0x274   :  { %v1047_v56 = vrot.slane %v1039_v54, 7  ;;  %v1433_v57 = vrot.slane %v1039_v54, 1  ;;  %v1041_v58 = vmax.f32 %v1033_v26, 0.0  ;;  %2064 = vmatprep.subr.bf16.mxu0 %v2351_v13  ;;  %v2369_v13 = vld [vmem:[#allocation5 + $0x150] sm:$0xff]   ;;  %v2371_v51 = vld [vmem:[#allocation5 + $0x158] sm:$0xff]   ;;  %v2375_v26 = vld [vmem:[#allocation5 + $0x168] sm:$0xff]  }
 0x275   :  { %v1048_v16 = vrot.slane %v1040_v27, 7  ;;  %v1434_v21 = vrot.slane %v1040_v27, 1  ;;  %v1042_v17 = vmax.f32 %v1034_v28, 0.0  ;;  %v2377_v28 = vld [vmem:[#allocation5 + $0x170] sm:$0xff]  }
 0x276   :  { %v2759_v19 = vsel %vm659_vm4, %v1431_v10, %v1433_v57  ;;  %v1049_v29 = vrot.slane %v1041_v58, 7  ;;  %v1435_v30 = vrot.slane %v1041_v58, 1  ;;  %v1105_v31 = vpack.c.bf16 %v1041_v58, %v1039_v54  ;;  %v2374_v54 = vld [vmem:[#allocation5 + $0x120] sm:$0xff]  }
 0x277   :  { %v2013_v60 = vpack.c.bf16 %v2759_v19, %v2747_v47  ;;  %v1050_v63 = vrot.slane %v1042_v17, 7  ;;  %v1436_v0 = vrot.slane %v1042_v17, 1  ;;  %2065 = vmatpush3.bf16.msra.mxu0 %v2352_v55  ;;  %v1106_v2 = vpack.c.bf16 %v1042_v17, %v1040_v27  ;;  %v2376_v27 = vld [vmem:[#allocation5 + $0x128] sm:$0xff]   ;;  %v2378_v55 = vld [vmem:[#allocation5 + $0x130] sm:$0xff]  }
 0x278   :  { %v1057_v61 = vsel %vm201_vm1, %v1049_v29, %v1043_v20  ;;  %2066 = vmatprep.subr.bf16.mxu0 %v2353_v59  ;;  %v1054_v6 = vsel %vm201_vm1, %v1046_v40, %v1048_v16  ;;  %v1051_v7 = vsel %vm201_vm1, %v1047_v56, %v1049_v29  ;;  %v1053_v8 = vsel %vm201_vm1, %v1045_v50, %v1047_v56  ;;  %v2356_v50 = vld [vmem:[#allocation5 + $0x18] sm:$0xff]   ;;  %v2357_v40 = vld [vmem:[#allocation5 + $0x60] sm:$0xff]  }
 0x279   :  { %v1985_v15 = vpack.c.bf16 %v2741_v46, %v1057_v61  ;;  %1275 = vmatprep.mubr.bf16.mxu0 %v1106_v2  ;;  %v1058_v62 = vsel %vm201_vm1, %v1050_v63, %v1044_v33  ;;  %v1052_v9 = vsel %vm201_vm1, %v1048_v16, %v1050_v63  ;;  %v1991_v20 = vpack.c.bf16 %v1051_v7, %v1053_v8  ;;  %v2365_v46 = vld [vmem:[#allocation5 + $0x140] sm:$0xff]   ;;  %v2380_v56 = vld [vmem:[#allocation5 + $0x138] sm:$0xff]  }
 0x27a   :  { %1276 = vmatmul.mubr.bf16.gmra.mrb[8].mxu0 %v1105_v31  ;;  %v1982_v24 = vpack.c.bf16 %v1056_v52, %v1058_v62  ;;  %v1988_v35 = vpack.c.bf16 %v1052_v9, %v1054_v6  ;;  %v1440_v41 = vsel %vm659_vm4, %v1432_v39, %v1434_v21  ;;  %v2780_v10 = vsel %vm659_vm4, %v1434_v21, %v1436_v0  ;;  %v2372_v52 = vld [vmem:[#allocation5 + $0x118] sm:$0xff]  }
 0x27b   :  { %2067 = vmatpush3.bf16.msra.mxu0 %v2354_v5  ;;  %v2010_v36 = vpack.c.bf16 %v1440_v41, %v2755_v53  ;;  %v1444_v33 = vsel %vm659_vm4, %v1436_v0, %v1430_v34  ;;  %v1437_v37 = vsel %vm659_vm4, %v1433_v57, %v1435_v30  ;;  %v1443_v38 = vsel %vm659_vm4, %v1435_v30, %v1429_v32  ;;  %v2359_v34 = vld [vmem:[#allocation5 + $0x68] sm:$0xff]   ;;  %v2363_v32 = vld [vmem:[#allocation5 + $0x78] sm:$0xff]   ;;  %v2373_v53 = vld [vmem:[#allocation5 + $0x160] sm:$0xff]  }
 0x27c   :  { %1983 = vmatprep.mubr.msk.bf16.mxu0 %vm2603_vm7, %v1982_v24  ;;  %2068 = vmatprep.subr.bf16.mxu0 %v2355_v3  ;;  %v2016_v39 = vpack.c.bf16 %v1444_v33, %v2780_v10  ;;  %v2019_v45 = vpack.c.bf16 %v1443_v38, %v1437_v37  ;;  %v2470_v57 = vmov 0.0   ;;  %v1640_v10 = vsub.s32 4, %v2548_v23 }
 0x27e   :  { %v1641_v38 = vrot.slane %v2554_v25, %v1640_v10 }
 0x27f   :  { %2069 = vmatpush3.bf16.msra.mxu0 %v2356_v50 }
 0x280   :  { %2070 = vmatprep.subr.bf16.mxu0 %v2357_v40 }
 0x283   :  { %2071 = vmatpush3.bf16.msra.mxu0 %v2358_v4 }
 0x284   :  { %2072 = vmatprep.subr.bf16.mxu0 %v2359_v34 }
 0x287   :  { %2073 = vmatpush3.bf16.msra.mxu0 %v2360_v11 }
 0x288   :  { %2074 = vmatprep.subr.bf16.mxu0 %v2361_v43 }
 0x28b   :  { %2075 = vmatpush3.bf16.msra.mxu0 %v2362_v18  ;;  %v1660_v18 = vmul.u32 16, %v2548_v23 }
 0x28c   :  { %2076 = vmatprep.subr.bf16.mxu0 %v2363_v32 }
 0x28f   :  { %2077 = vmatpush3.bf16.msra.mxu0 %v2364_v44 }
 0x290   :  { %2090 = vmatprep.subr.bf16.mxu0 %v2365_v46 }
 0x292   :  { %1986 = vmatmul.mubr.msk.bf16.vlgmr.msra.gmra.mrb[12].mxu0 %vm2603_vm7, %v1985_v15 }
 0x293   :  { %1989 = vmatprep.mubr.msk.bf16.mxu0 %vm2603_vm7, %v1988_v35  ;;  %2091 = vmatpush3.bf16.msra.mxu0 %v2366_v48 }
 0x294   :  { %2092 = vmatprep.subr.bf16.mxu0 %v2367_v49  ;;  %v1659_v49 = vand.u32 127, %v141_v22 }
 0x296   :  { %vm1661_vm15 = vcmp.ge.s32.totalorder %v1659_v49, %v1660_v18 }
 0x297   :  { %2093 = vmatpush3.bf16.msra.mxu0 %v2368_v12 }
 0x298   :  { %2094 = vmatprep.subr.bf16.mxu0 %v2369_v13 }
 0x29a   :  { %1992 = vmatmul.mubr.msk.bf16.gmra.mrb[16].mxu0 %vm2603_vm7, %v1991_v20 }
 0x29b   :  { %2095 = vmatpush3.bf16.msra.mxu0 %v2370_v14  ;;  %2011 = vmatprep.mubr.msk.bf16.mxu0 %vm2693_vm11, %v2010_v36  ;;  %v1648_v36 = vsub.s32 5, %v2548_v23 }
 0x29c   :  { %2096 = vmatprep.subr.bf16.mxu0 %v2371_v51  ;;  %v1662_v51 = vadd.s32 16, %v1660_v18 }
 0x29d   :  { %v1649_v4 = vrot.slane %v2554_v25, %v1648_v36 }
 0x29e   :  { %vm1663_vm1 = vcmp.lt.s32.totalorder %v1659_v49, %v1662_v51 }
 0x29f   :  { %2097 = vmatpush3.bf16.msra.mxu0 %v2372_v52  ;;  %vm1664_vm2 = vmand %vm1661_vm15, %vm1663_vm1 }
 0x2a0   :  { %2098 = vmatprep.subr.bf16.mxu0 %v2373_v53 }
 0x2a3   :  { %2099 = vmatpush3.bf16.msra.mxu0 %v2374_v54 }
 0x2a4   :  { %2100 = vmatprep.subr.bf16.mxu0 %v2375_v26 }
 0x2a7   :  { %2101 = vmatpush3.bf16.msra.mxu0 %v2376_v27 }
 0x2a8   :  { %2102 = vmatprep.subr.bf16.mxu0 %v2377_v28 }
 0x2ab   :  { %2103 = vmatpush3.bf16.msra.mxu0 %v2378_v55 }
 0x2ac   :  { %2104 = vmatprep.subr.bf16.mxu0 %v2379_v1 }
 0x2af   :  { %2105 = vmatpush3.bf16.msra.mxu0 %v2380_v56 }
 0x2b0   :  { %2138 = vmatprep.subr.bf16.mxu0 %v2470_v57 }
 0x2b2   :  { %2014 = vmatmul.mubr.msk.bf16.vlgmr.msra.gmra.mrb[20].mxu0 %vm2693_vm11, %v2013_v60 }
 0x2b3   :  { %2017 = vmatprep.mubr.msk.bf16.mxu0 %vm2693_vm11, %v2016_v39 }
 0x2ba   :  { %2020 = vmatmul.mubr.msk.bf16.gmra.mrb[24].mxu0 %vm2693_vm11, %v2019_v45 }
 0x2bb   :  { %2142 = vmatprep.mubr.msk.bf16.mxu0 %vm2471_vm14, %v2470_v57 }
 0x345   :  { %v2050_v58 = vpop.f32.mrb[4].mxu0 }
 0x346   :  { %v2051_v59 = vpop.f32.mrb[5].mxu0 }
 0x347   :  { %v2052_v16 = vadd.f32 %v2051_v59, %v2050_v58  ;;  %v2053_v47 = vpop.f32.mrb[6].mxu0 }
 0x348   :  { %v2054_v21 = vpop.f32.mrb[7].mxu0 }
 0x349   :  { %v2055_v17 = vadd.f32 %v2054_v21, %v2053_v47 }
 0x34d   :  { %v2056_v19 = vpop.f32.mrb[8].mxu0 }
 0x34e   :  { %v2057_v29 = vpop.f32.mrb[9].mxu0 }
 0x34f   :  { %v2058_v30 = vadd.f32 %v2057_v29, %v2056_v19  ;;  %v2059_v31 = vpop.f32.mrb[10].mxu0  ;;  %v2382_v19 = vld [vmem:[%s2879_s4 + $0x8] sm:$0xff]   ;;  %v2383_v29 = vld [vmem:[%s2879_s4 + $0x10] sm:$0xff]  }
 0x350   :  { %v2060_v60 = vpop.f32.mrb[11].mxu0 }
 0x351   :  { %v2061_v42 = vadd.f32 %v2060_v60, %v2059_v31  ;;  %v2385_v31 = vld [vmem:[%s2879_s4 + $0x20] sm:$0xff]   ;;  %v2386_v60 = vld [vmem:[%s2879_s4 + $0x28] sm:$0xff]  }
 0x365   :  { %v2078_v63 = vpop.f32.mrb[12].mxu0 }
 0x366   :  { %v2079_v0 = vpop.f32.mrb[13].mxu0 }
 0x367   :  { %v2080_v2 = vadd.f32 %v2079_v0, %v2078_v63  ;;  %v2081_v5 = vpop.f32.mrb[14].mxu0  ;;  %v2388_v63 = vld [vmem:[%s2879_s4 + $0x38] sm:$0xff]  }
 0x368   :  { %v2082_v61 = vpop.f32.mrb[15].mxu0 }
 0x369   :  { %v1415_v3 = vadd.f32 %v2080_v2, %v2052_v16  ;;  %v2083_v6 = vadd.f32 %v2082_v61, %v2081_v5  ;;  %v1665_v16 = vsel %vm1664_vm2, 0.0625, %v2470_v57 }
 0x36a   :  { %v1666_v21 = vpack.c.bf16 %v1665_v16, %v1665_v16 }
 0x36b   :  { %v1418_v7 = vadd.f32 %v2083_v6, %v2055_v17  ;;  %v2381_v17 = vld [vmem:[%s2879_s4] sm:$0xff]   ;;  %v1731_v6 = vsub.s32 6, %v2548_v23 }
 0x36d   :  { %v2084_v8 = vpop.f32.mrb[16].mxu0 }
 0x36e   :  { %v2085_v15 = vpop.f32.mrb[17].mxu0 }
 0x36f   :  { %v2086_v62 = vadd.f32 %v2085_v15, %v2084_v8  ;;  %v2087_v9 = vpop.f32.mrb[18].mxu0 }
 0x370   :  { %v2088_v20 = vpop.f32.mrb[19].mxu0 }
 0x371   :  { %v1423_v24 = vadd.f32 %v2086_v62, %v2058_v30  ;;  %v2089_v35 = vadd.f32 %v2088_v20, %v2087_v9  ;;  %v2384_v30 = vld [vmem:[%s2879_s4 + $0x18] sm:$0xff]  }
 0x373   :  { %v1426_v41 = vadd.f32 %v2089_v35, %v2061_v42  ;;  %v2387_v42 = vld [vmem:[%s2879_s4 + $0x30] sm:$0xff]   ;;  %s2434_s4 = scalar_lea.vmem %s1830_s27, 32 }
 0x374   :  { %p2435_p2 = scmp.ne.s32.totalorder %s1830_s27, %s2434_s4  ;;  %p2440_p4 = scmp.lt.s32.totalorder %s2434_s4, %s2434_s4 }
 0x376   :  { %p2441_p5 = por %p2440_p4, %p2439_p3 }
 0x378   :  { %p2442_p6 = pnand %p2441_p5, %p2435_p2 }
 0x385   :  { %v2106_v50 = vpop.f32.mrb[20].mxu0 }
 0x386   :  { %v2107_v33 = vpop.f32.mrb[21].mxu0 }
 0x387   :  { %v2108_v37 = vadd.f32 %v2107_v33, %v2106_v50  ;;  %v2109_v40 = vpop.f32.mrb[22].mxu0 }
 0x388   :  { %v2110_v39 = vpop.f32.mrb[23].mxu0 }
 0x389   :  { %v1634_v45 = vadd.f32 %v2108_v37, %v1415_v3  ;;  %v2111_v34 = vadd.f32 %v2110_v39, %v2109_v40 }
 0x38b   :  { %v1642_v11 = vmul.f32 %v1641_v38, %v1634_v45  ;;  %v1635_v43 = vadd.f32 %v2111_v34, %v1418_v7  ;;  %v2389_v7 = vld [vmem:[%s2880_s5] sm:$0xff] }
 0x38c   :  { %v1732_v8 = vrot.slane %v2389_v7, %v1731_v6 }
 0x38d   :  { %v1650_v32 = vadd.f32 %v1649_v4, %v1642_v11  ;;  %v1643_v44 = vmul.f32 %v1641_v38, %v1635_v43  ;;  %v2112_v46 = vpop.f32.mrb[24].mxu0 }
 0x38e   :  { %v2113_v48 = vpop.f32.mrb[25].mxu0 }
 0x38f   :  { %v1651_v12 = vadd.f32 %v1649_v4, %v1643_v44  ;;  %v2114_v13 = vadd.f32 %v2113_v48, %v2112_v46  ;;  %v2115_v14 = vpop.f32.mrb[26].mxu0  ;;  %v1654_v53 = vmax.f32 %v1650_v32, 0.0 }
 0x390   :  { %v2116_v52 = vpop.f32.mrb[27].mxu0 }
 0x391   :  { %v1655_v54 = vmax.f32 %v1651_v12, 0.0  ;;  %v1636_v26 = vadd.f32 %v2114_v13, %v1423_v24  ;;  %v2117_v25 = vadd.f32 %v2116_v52, %v2115_v14 }
 0x393   :  { %v1644_v27 = vmul.f32 %v1641_v38, %v1636_v26  ;;  %v1637_v28 = vadd.f32 %v2117_v25, %v1426_v41  ;;  %v1667_v55 = vpack.c.bf16 %v1655_v54, %v1654_v53 }
 0x395   :  { %v1652_v1 = vadd.f32 %v1649_v4, %v1644_v27  ;;  %v1645_v56 = vmul.f32 %v1641_v38, %v1637_v28  ;;  %2139 = vmatpush3.bf16.msra.mxu0 %v1667_v55 }
 0x396   :  { %2140 = vmatprep.subr.bf16.mxu0 %v2470_v57 }
 0x397   :  { %v1653_v22 = vadd.f32 %v1649_v4, %v1645_v56  ;;  %v1656_v58 = vmax.f32 %v1652_v1, 0.0 }
 0x399   :  { %v1657_v59 = vmax.f32 %v1653_v22, 0.0 }
 0x39b   :  { %v1668_v47 = vpack.c.bf16 %v1657_v59, %v1656_v58 }
 0x39d   :  { %2141 = vmatpush3.bf16.msra.mxu0 %v1668_v47 }
 0x39e   :  { %2146 = vmatprep.subr.bf16.mxu0 %v2470_v57 }
 0x3a0   :  { %2143 = vmatmul.mubr.msk.bf16.vlgmr.msra.gmra.mrb[28].mxu0 %vm85_vm0, %v1666_v21  ;;  %vm1821_vm0 = vcmask 17408  }
 0x3a1   :  { %2147 = vmatpush3.bf16.msra.mxu0 %v2381_v17  ;;  %2162 = vmatprep.mubr.msk.bf16.mxu0 %vm2471_vm14, %v2470_v57 }
 0x3a2   :  { %2148 = vmatprep.subr.bf16.mxu0 %v2470_v57 }
 0x3a5   :  { %2149 = vmatpush3.bf16.msra.mxu0 %v2382_v19 }
 0x3a6   :  { %2150 = vmatprep.subr.bf16.mxu0 %v2470_v57 }
 0x3a9   :  { %2151 = vmatpush3.bf16.msra.mxu0 %v2383_v29 }
 0x3aa   :  { %2152 = vmatprep.subr.bf16.mxu0 %v2470_v57 }
 0x3ad   :  { %2153 = vmatpush3.bf16.msra.mxu0 %v2384_v30 }
 0x3ae   :  { %2154 = vmatprep.subr.bf16.mxu0 %v2470_v57 }
 0x3b1   :  { %2155 = vmatpush3.bf16.msra.mxu0 %v2385_v31 }
 0x3b2   :  { %2156 = vmatprep.subr.bf16.mxu0 %v2470_v57 }
 0x3b5   :  { %2157 = vmatpush3.bf16.msra.mxu0 %v2386_v60 }
 0x3b6   :  { %2158 = vmatprep.subr.bf16.mxu0 %v2470_v57 }
 0x3b9   :  { %2159 = vmatpush3.bf16.msra.mxu0 %v2387_v42 }
 0x3ba   :  { %2160 = vmatprep.subr.bf16.mxu0 %v2470_v57 }
 0x3bd   :  { %2161 = vmatpush3.bf16.msra.mxu0 %v2388_v63 }
 0x473   :  { %v1706_v0 = vpop.f32.mrb[28].mxu0 }
 0x474   :  { %v1712_v2 = vpack.c.bf16 %v1706_v0, %v1706_v0  ;;  %v2144_v5 = vpop.f32.mrb[29].mxu0 }
 0x475   :  { %v1709_v61 = vpop.f32.mrb[30].mxu0 }
 0x476   :  { %v2145_v3 = vpop.f32.mrb[31].mxu0  ;;  %2163 = vmatmul.mubr.bf16.vlgmr.msra.gmra.mrb[32].mxu0 %v1712_v2 }
 0x549   :  { %v1815_v57 = vpop.f32.mrb[32].mxu0 }
 0x54a   :  { %v1816_v15 = vadd.f32 %v1815_v57, %v1732_v8  ;;  %v2164_v62 = vpop.f32.mrb[33].mxu0 }
 0x54b   :  { %v1818_v9 = vpop.f32.mrb[34].mxu0 }
 0x54c   :  { %v2165_v20 = vpop.f32.mrb[35].mxu0  ;;  %1822 = vst.msk [vmem:[#allocation7] sm:$0x3] %vm1821_vm0, %v1816_v15 }
 0x54d   :  { %2445 = shalt.err (!%p2442_p6)
}
 0x54e   :  { %s2446_s29 = scalar_lea.hbm %s2881_s6, 32 }
 0x54f   :  { %p2447_p7 = scmp.ne.s32.totalorder %s2881_s6, %s2446_s29  ;;  %p2450_p8 = scmp.lt.u32.totalorder %s2446_s29, %s2881_s6 }
 0x551   :  { %p2452_p9 = pnand %p2450_p8, %p2447_p7 }
 0x553   :  { %2455 = shalt.err (!%p2452_p9)
}
 0x554   :  { %1832 = dma.vmem_to_hbm [thread:$0]  %s1830_s27, 32, %s2881_s6, [#allocation4]  }
 0x555   :  { %2460 = dma.done.wait [#allocation4], 32  }
 0x556   :  { %2461 = vsyncadd [#allocation4], 4294967264 }
 0x557   :  { %1836 = vsyncpa [#allocation3], 1 }
 0x558   :  { %1837 = vsyncpa [#allocation6], 1 }
 0x559   :  { %1838 = vsyncpa [#allocation4], 1 }

</bundles_post_ra>
